<compile_context>
chip_gen: v7x
topology: tpu7x:2x2x1
jax: 0.10.0
libtpu: 0.0.40
codegen_flags: <defaults>
</compile_context>

<pallas_src>
import math

import jax
import jax.numpy as jnp
from jax.experimental import pallas as pl
from jax.experimental.pallas import tpu as pltpu


def _gelu_exact(x):
    # Matches torch.nn.functional.gelu default (erf-based, not tanh approx).
    return 0.5 * x * (1.0 + jax.lax.erf(x * (1.0 / math.sqrt(2.0))))


def _cell_state_init_kernel(x_ref, w0_ref, b0_ref, w1_ref, b1_ref,
                            w2_ref, b2_ref, o_ref):
    # Single row-tile grid step: three fused matmuls, all weights resident.
    h0 = jnp.dot(x_ref[...], w0_ref[...], preferred_element_type=jnp.float32)
    h0 = _gelu_exact(h0 + b0_ref[...])
    h1 = jnp.dot(h0, w1_ref[...], preferred_element_type=jnp.float32)
    h1 = _gelu_exact(h1 + b1_ref[...])
    # Fused layer 2: [TM, H] @ [H, P*H] -> lane-dense [TM, P*H] result.
    h2 = jnp.dot(h1, w2_ref[...], preferred_element_type=jnp.float32)
    o_ref[...] = (h2 + b2_ref[...]).astype(o_ref.dtype)


def prepare_params(params, hidden_dim, rnn_depth):
    """One-time conversion from PyTorch nn.Linear layout (W:[out,in], b:[out])
    to the kernel layout (W^T:[in,out]; layer2 kept fused as [H, P*H])."""
    w0, b0, w1, b1, w2, b2 = params
    H, P = hidden_dim, rnn_depth
    w0t = jnp.asarray(w0).T                      # [D, H]
    w1t = jnp.asarray(w1).T                      # [H, H]
    w2t = jnp.asarray(w2).T                      # [H, P*H]  (cols ordered p*H + h)
    b0r = jnp.asarray(b0).reshape(1, H)
    b1r = jnp.asarray(b1).reshape(1, H)
    b2r = jnp.asarray(b2).reshape(1, P * H)
    return (w0t, b0r, w1t, b1r, w2t, b2r)


def _roundup(x, m):
    return ((x + m - 1) // m) * m


def _choose_tm(N, D, H, P, tm_hint):
    """Pick the row-tile size: multiple of 8, >=2 tiles when possible (v7x has
    2 TensorCores), and small enough that the VMEM footprint stays ~<=40 MiB
    (safe under v7x's 64 MiB physical VMEM; v5e/v6e have 128 MiB)."""
    tm = min(tm_hint, _roundup(N, 8))
    tm = max(8, _roundup(tm, 8))
    # Feed both TensorCores on v7x when N is big enough for >=2 tiles.
    if pl.cdiv(N, tm) < 2 and N > 8:
        tm = max(8, _roundup(pl.cdiv(N, 2), 8))

    def vmem_bytes(t):
        x_buf = 2 * t * D * 4            # double-buffered input tile
        o_buf = 2 * t * P * H * 4        # double-buffered output tile
        weights = (D * H + H * H + H * P * H + 2 * H + P * H) * 4  # resident
        interm = 3 * t * H * 4           # h0/h1 temporaries (headroom)
        return x_buf + o_buf + weights + interm

    while tm > 8 and vmem_bytes(tm) > 40 * 1024 * 1024:
        tm = max(8, _roundup(tm // 2, 8))
    return tm, vmem_bytes(tm)


def cell_state_initializer(lxm, prepped_params, hidden_dim, rnn_depth, *, tm=512):
    """lxm: [N, D] float32.  Returns [rnn_depth, N, hidden_dim] (same semantics
    as the PyTorch module: reshape + 'NPD->PND' transpose)."""
    w0t, b0r, w1t, b1r, w2t, b2r = prepped_params
    N, D = lxm.shape
    H, P = hidden_dim, rnn_depth

    TM, budget = _choose_tm(N, D, H, P, tm)
    n_row_tiles = pl.cdiv(N, TM)
    vmem_limit = int(min(48 * 1024 * 1024, max(16 * 1024 * 1024, budget + 4 * 1024 * 1024)))

    cost = pl.CostEstimate(
        flops=2 * N * (D * H + H * H + P * H * H),
        transcendentals=2 * N * H,
        bytes_accessed=4 * (N * D + D * H + H * H + P * H * H
                            + 2 * H + P * H + N * P * H),
    )

    out_flat = pl.pallas_call(
        _cell_state_init_kernel,
        out_shape=jax.ShapeDtypeStruct((N, P * H), jnp.float32),
        grid_spec=pltpu.PrefetchScalarGridSpec(
            num_scalar_prefetch=0,
            grid=(n_row_tiles,),
            in_specs=[
                pl.BlockSpec((TM, D), lambda i: (i, 0)),        # x rows (pipelined)
                pl.BlockSpec((D, H), lambda i: (0, 0)),         # W0^T  (resident)
                pl.BlockSpec((1, H), lambda i: (0, 0)),         # b0
                pl.BlockSpec((H, H), lambda i: (0, 0)),         # W1^T
                pl.BlockSpec((1, H), lambda i: (0, 0)),         # b1
                pl.BlockSpec((H, P * H), lambda i: (0, 0)),     # W2^T fused (resident)
                pl.BlockSpec((1, P * H), lambda i: (0, 0)),     # b2 fused
            ],
            out_specs=pl.BlockSpec((TM, P * H), lambda i: (i, 0)),  # lane-dense out
        ),
        compiler_params=pltpu.CompilerParams(
            dimension_semantics=("parallel",),
            vmem_limit_bytes=vmem_limit,
        ),
        cost_estimate=cost,
    )(lxm, w0t, b0r, w1t, b1r, w2t, b2r)

    # Trivial layout-only op in XLA; keeps the kernel's stores lane-dense even
    # when H < 128 (same result as torch: reshape + einsum('NPD->PND')).
    return jnp.transpose(out_flat.reshape(N, P, H), (1, 0, 2))


def init_params(key, in_dim, hidden_dim, rnn_depth):
    """Deterministic init mimicking nn.Linear default (uniform +/- 1/sqrt(fan_in)).
    Returned in PyTorch layout: W [out, in], b [out]."""
    keys = jax.random.split(key, 6)

    def linear(kw, kb, fan_in, fan_out):
        bound = 1.0 / math.sqrt(fan_in)
        w = jax.random.uniform(kw, (fan_out, fan_in), jnp.float32, -bound, bound)
        b = jax.random.uniform(kb, (fan_out,), jnp.float32, -bound, bound)
        return w, b

    w0, b0 = linear(keys[0], keys[1], in_dim, hidden_dim)
    w1, b1 = linear(keys[2], keys[3], hidden_dim, hidden_dim)
    w2, b2 = linear(keys[4], keys[5], hidden_dim, hidden_dim * rnn_depth)
    return (w0, b0, w1, b1, w2, b2)


if __name__ == "__main__":
    N, IN_DIM, HIDDEN, RNN_DEPTH = 8, 16, 32, 3

    key = jax.random.PRNGKey(0)
    k_x, k_p = jax.random.split(key)
    lxm = jax.random.normal(k_x, (N, IN_DIM), jnp.float32)
    params = init_params(k_p, IN_DIM, HIDDEN, RNN_DEPTH)

    # One-time layout prep (done at init time in a real model, not per call).
    prepped = prepare_params(params, HIDDEN, RNN_DEPTH)

    out = cell_state_initializer(lxm, prepped, HIDDEN, RNN_DEPTH)
    out = jax.block_until_ready(out)

    # Pure-JAX reference check (same math, outside Pallas), PyTorch layout.
    w0, b0, w1, b1, w2, b2 = params
    ref = _gelu_exact(lxm @ w0.T + b0)
    ref = _gelu_exact(ref @ w1.T + b1)
    ref = ref @ w2.T + b2
    ref = jnp.transpose(ref.reshape(N, RNN_DEPTH, HIDDEN), (1, 0, 2))

    assert out.shape == (RNN_DEPTH, N, HIDDEN), out.shape
    assert jnp.allclose(out, ref, atol=1e-5, rtol=1e-5)
    print("KERNEL_OK")
</pallas_src>

<mosaic_0001>
module attributes {stable_mosaic.version = 11 : i64} {
  func.func @_cell_state_init_kernel(%arg0: i32, %arg1: memref<8x16xf32, #tpu.memory_space<vmem>>, %arg2: memref<16x32xf32, #tpu.memory_space<vmem>>, %arg3: memref<1x32xf32, #tpu.memory_space<vmem>>, %arg4: memref<32x32xf32, #tpu.memory_space<vmem>>, %arg5: memref<1x32xf32, #tpu.memory_space<vmem>>, %arg6: memref<32x96xf32, #tpu.memory_space<vmem>>, %arg7: memref<1x96xf32, #tpu.memory_space<vmem>>, %arg8: memref<8x96xf32, #tpu.memory_space<vmem>>) attributes {dimension_semantics = [#tpu.dimension_semantics<parallel>], iteration_bounds = array<i64: 1>, scalar_prefetch = 0 : i64, scratch_operands = 0 : i64, tpu.core_type = #tpu.core_type<tc>, window_params = [{transform_indices = @transform_0, window_bounds = array<i64: 8, 16>}, {pipeline_mode = #tpu.pipeline_mode<synchronous>, transform_indices = @transform_1, window_bounds = array<i64: 16, 32>}, {pipeline_mode = #tpu.pipeline_mode<synchronous>, transform_indices = @transform_2, window_bounds = array<i64: 1, 32>}, {pipeline_mode = #tpu.pipeline_mode<synchronous>, transform_indices = @transform_3, window_bounds = array<i64: 32, 32>}, {pipeline_mode = #tpu.pipeline_mode<synchronous>, transform_indices = @transform_4, window_bounds = array<i64: 1, 32>}, {pipeline_mode = #tpu.pipeline_mode<synchronous>, transform_indices = @transform_5, window_bounds = array<i64: 32, 96>}, {pipeline_mode = #tpu.pipeline_mode<synchronous>, transform_indices = @transform_6, window_bounds = array<i64: 1, 96>}, {transform_indices = @transform_7, window_bounds = array<i64: 8, 96>}]} {
    %c0 = arith.constant 0 : index
    %c0_0 = arith.constant 0 : index
    %0 = vector.load %arg1[%c0, %c0_0] : memref<8x16xf32, #tpu.memory_space<vmem>>, vector<8x16xf32>
    %c0_1 = arith.constant 0 : index
    %c0_2 = arith.constant 0 : index
    %1 = vector.load %arg2[%c0_1, %c0_2] : memref<16x32xf32, #tpu.memory_space<vmem>>, vector<16x32xf32>
    %cst = arith.constant dense<0.000000e+00> : vector<8x32xf32>
    %2 = tpu.matmul %0, %1, %cst {dimension_numbers = #tpu.dot_dimension_numbers<[1], [0], [0], [1], [0, 0, 1, 1], [], []>} : vector<8x16xf32>, vector<16x32xf32>, vector<8x32xf32> -> vector<8x32xf32>
    %c0_3 = arith.constant 0 : index
    %c0_4 = arith.constant 0 : index
    %3 = vector.load %arg3[%c0_3, %c0_4] : memref<1x32xf32, #tpu.memory_space<vmem>>, vector<1x32xf32>
    %4 = vector.broadcast %3 : vector<1x32xf32> to vector<8x32xf32>
    %5 = arith.addf %2, %4 : vector<8x32xf32>
    %cst_5 = arith.constant 5.000000e-01 : f32
    %6 = vector.broadcast %cst_5 : f32 to vector<8x32xf32>
    %7 = arith.mulf %6, %5 : vector<8x32xf32>
    %cst_6 = arith.constant 0.707106769 : f32
    %8 = vector.broadcast %cst_6 : f32 to vector<8x32xf32>
    %9 = arith.mulf %5, %8 : vector<8x32xf32>
    %10 = math.erf %9 : vector<8x32xf32>
    %cst_7 = arith.constant 1.000000e+00 : f32
    %11 = vector.broadcast %cst_7 : f32 to vector<8x32xf32>
    %12 = arith.addf %11, %10 : vector<8x32xf32>
    %13 = arith.mulf %7, %12 : vector<8x32xf32>
    %c0_8 = arith.constant 0 : index
    %c0_9 = arith.constant 0 : index
    %14 = vector.load %arg4[%c0_8, %c0_9] : memref<32x32xf32, #tpu.memory_space<vmem>>, vector<32x32xf32>
    %cst_10 = arith.constant dense<0.000000e+00> : vector<8x32xf32>
    %15 = tpu.matmul %13, %14, %cst_10 {dimension_numbers = #tpu.dot_dimension_numbers<[1], [0], [0], [1], [0, 0, 1, 1], [], []>} : vector<8x32xf32>, vector<32x32xf32>, vector<8x32xf32> -> vector<8x32xf32>
    %c0_11 = arith.constant 0 : index
    %c0_12 = arith.constant 0 : index
    %16 = vector.load %arg5[%c0_11, %c0_12] : memref<1x32xf32, #tpu.memory_space<vmem>>, vector<1x32xf32>
    %17 = vector.broadcast %16 : vector<1x32xf32> to vector<8x32xf32>
    %18 = arith.addf %15, %17 : vector<8x32xf32>
    %cst_13 = arith.constant 5.000000e-01 : f32
    %19 = vector.broadcast %cst_13 : f32 to vector<8x32xf32>
    %20 = arith.mulf %19, %18 : vector<8x32xf32>
    %cst_14 = arith.constant 0.707106769 : f32
    %21 = vector.broadcast %cst_14 : f32 to vector<8x32xf32>
    %22 = arith.mulf %18, %21 : vector<8x32xf32>
    %23 = math.erf %22 : vector<8x32xf32>
    %cst_15 = arith.constant 1.000000e+00 : f32
    %24 = vector.broadcast %cst_15 : f32 to vector<8x32xf32>
    %25 = arith.addf %24, %23 : vector<8x32xf32>
    %26 = arith.mulf %20, %25 : vector<8x32xf32>
    %c0_16 = arith.constant 0 : index
    %c0_17 = arith.constant 0 : index
    %27 = vector.load %arg6[%c0_16, %c0_17] : memref<32x96xf32, #tpu.memory_space<vmem>>, vector<32x96xf32>
    %cst_18 = arith.constant dense<0.000000e+00> : vector<8x96xf32>
    %28 = tpu.matmul %26, %27, %cst_18 {dimension_numbers = #tpu.dot_dimension_numbers<[1], [0], [0], [1], [0, 0, 1, 1], [], []>} : vector<8x32xf32>, vector<32x96xf32>, vector<8x96xf32> -> vector<8x96xf32>
    %c0_19 = arith.constant 0 : index
    %c0_20 = arith.constant 0 : index
    %29 = vector.load %arg7[%c0_19, %c0_20] : memref<1x96xf32, #tpu.memory_space<vmem>>, vector<1x96xf32>
    %30 = vector.broadcast %29 : vector<1x96xf32> to vector<8x96xf32>
    %31 = arith.addf %28, %30 : vector<8x96xf32>
    %c0_21 = arith.constant 0 : index
    %c0_22 = arith.constant 0 : index
    %32 = vector.load %arg8[%c0_21, %c0_22] : memref<8x96xf32, #tpu.memory_space<vmem>>, vector<8x96xf32>
    tpu.vector_store %arg8[%c0_21, %c0_22], %31 {strides = array<i32>} : memref<8x96xf32, #tpu.memory_space<vmem>>, vector<8x96xf32>,
    return
  }
  func.func @transform_0(%arg0: i32) -> (i32, i32) {
    %c0_i32 = arith.constant 0 : i32
    %c0_i32_0 = arith.constant 0 : i32
    return %arg0, %c0_i32 : i32, i32
  }
  func.func @transform_1(%arg0: i32) -> (i32, i32) {
    %c0_i32 = arith.constant 0 : i32
    %c0_i32_0 = arith.constant 0 : i32
    %c0_i32_1 = arith.constant 0 : i32
    return %c0_i32, %c0_i32_0 : i32, i32
  }
  func.func @transform_2(%arg0: i32) -> (i32, i32) {
    %c0_i32 = arith.constant 0 : i32
    %c0_i32_0 = arith.constant 0 : i32
    %c0_i32_1 = arith.constant 0 : i32
    return %c0_i32, %c0_i32_0 : i32, i32
  }
  func.func @transform_3(%arg0: i32) -> (i32, i32) {
    %c0_i32 = arith.constant 0 : i32
    %c0_i32_0 = arith.constant 0 : i32
    %c0_i32_1 = arith.constant 0 : i32
    return %c0_i32, %c0_i32_0 : i32, i32
  }
  func.func @transform_4(%arg0: i32) -> (i32, i32) {
    %c0_i32 = arith.constant 0 : i32
    %c0_i32_0 = arith.constant 0 : i32
    %c0_i32_1 = arith.constant 0 : i32
    return %c0_i32, %c0_i32_0 : i32, i32
  }
  func.func @transform_5(%arg0: i32) -> (i32, i32) {
    %c0_i32 = arith.constant 0 : i32
    %c0_i32_0 = arith.constant 0 : i32
    %c0_i32_1 = arith.constant 0 : i32
    return %c0_i32, %c0_i32_0 : i32, i32
  }
  func.func @transform_6(%arg0: i32) -> (i32, i32) {
    %c0_i32 = arith.constant 0 : i32
    %c0_i32_0 = arith.constant 0 : i32
    %c0_i32_1 = arith.constant 0 : i32
    return %c0_i32, %c0_i32_0 : i32, i32
  }
  func.func @transform_7(%arg0: i32) -> (i32, i32) {
    %c0_i32 = arith.constant 0 : i32
    %c0_i32_0 = arith.constant 0 : i32
    return %arg0, %c0_i32 : i32, i32
  }
}

</mosaic_0001>

<bundles_post_ra>
// kernel: tpu_custom_call.1
= control target key start
LH: loop header
LB: loop body
LE: loop exit
PB: predicated region body
PF: predicated region fallthrough
CT: control target
= control target key end

     0   :  { %12 = vsyncpa [#allocation3], 0  ;;  %s687_s0 = inlined_call_operand.hbm [shape: f32[8,16], index: 0, kind: input, shape index: {}]   ;;  %s688_s1 = inlined_call_operand.hbm [shape: f32[16,32], index: 1, kind: input, shape index: {}]   ;;  %s689_s2 = inlined_call_operand.vmem [shape: f32[1,32], index: 2, kind: input, shape index: {}]   ;;  %s690_s3 = inlined_call_operand.hbm [shape: f32[32,32], index: 3, kind: input, shape index: {}]   ;;  %s691_s4 = inlined_call_operand.vmem [shape: f32[1,32], index: 4, kind: input, shape index: {}]   ;;  %s692_s5 = inlined_call_operand.hbm [shape: f32[32,96], index: 5, kind: input, shape index: {}]   ;;  %s693_s6 = inlined_call_operand.vmem [shape: f32[1,96], index: 6, kind: input, shape index: {}]   ;;  %s694_s7 = inlined_call_operand.hbm [shape: f32[8,96], index: 7, kind: output, shape index: {}]  }
   0x1   :  { %13 = vsyncpa [#allocation6], 0 }
   0x2   :  { %14 = vsyncpa [#allocation9], 0 }
   0x3   :  { %15 = vsyncpa [#allocation4], 0  ;;  %s557_s24 = smov [#allocation5]   ;;  %s439_s28 = scalar_lea.hbm %s688_s1, 256 }
   0x4   :  { %s31_s25 = sshll.u32 %s557_s24, 4  ;;  %p440_p0 = scmp.ne.s32.totalorder %s688_s1, %s439_s28  ;;  %s32_s25 = int_to_ptr.vmem [resolvable:$true] %s31_s25 }
   0x5   :  { %p443_p1 = scmp.lt.u32.totalorder %s439_s28, %s688_s1 }
   0x7   :  { %p445_p2 = pnand %p443_p1, %p440_p0 }
   0x9   :  { %448 = shalt.err (!%p445_p2)
}
   0xa   :  { %s449_s10 = scalar_lea.vmem %s32_s25, 256  ;;  %p454_p4 = scmp.lt.s32.totalorder %s32_s25, %s32_s25 }
   0xb   :  { %p450_p3 = scmp.ne.s32.totalorder %s32_s25, %s449_s10  ;;  %p455_p5 = scmp.lt.s32.totalorder %s449_s10, %s449_s10 }
   0xd   :  { %p456_p6 = por %p455_p5, %p454_p4 }
   0xf   :  { %p457_p7 = pnand %p456_p6, %p450_p3 }
  0x11   :  { %460 = shalt.err (!%p457_p7)
}
  0x12   :  { %s558_s11 = smov 128   ;;  %s559_s12 = smov 8  }
  0x13   :  { %37 = dma.hbm_to_vmem [thread:$0]  %s688_s1, 256, %s32_s25, [#allocation6], %s558_s11, %s558_s11, %s559_s12  }
  0x14   :  { %s560_s15 = smov [#allocation2]   ;;  %s561_s17 = smov [#allocation7]  }
  0x15   :  { %s22_s16 = sshll.u32 %s560_s15, 4  ;;  %s45_s18 = sshll.u32 %s561_s17, 4  ;;  %s23_s16 = int_to_ptr.vmem [resolvable:$true] %s22_s16  ;;  %s46_s18 = int_to_ptr.vmem [resolvable:$true] %s45_s18 }
  0x16   :  { %s461_s21 = scalar_lea.hbm %s687_s0, 128 }
  0x17   :  { %p462_p8 = scmp.ne.s32.totalorder %s687_s0, %s461_s21  ;;  %p465_p9 = scmp.lt.u32.totalorder %s461_s21, %s687_s0 }
  0x19   :  { %p467_p10 = pnand %p465_p9, %p462_p8 }
  0x1b   :  { %470 = shalt.err (!%p467_p10)
}
  0x1c   :  { %s471_s1 = scalar_lea.vmem %s23_s16, 128  ;;  %p476_p12 = scmp.lt.s32.totalorder %s23_s16, %s23_s16 }
  0x1d   :  { %p472_p11 = scmp.ne.s32.totalorder %s23_s16, %s471_s1  ;;  %p477_p13 = scmp.lt.s32.totalorder %s471_s1, %s471_s1 }
  0x1f   :  { %p478_p0 = por %p477_p13, %p476_p12 }
  0x21   :  { %p479_p1 = pnand %p478_p0, %p472_p11 }
  0x23   :  { %482 = shalt.err (!%p479_p1)
}
  0x24   :  { %25 = dma.hbm_to_vmem [thread:$0]  %s687_s0, 128, %s23_s16, [#allocation3]  }
  0x25   :  { %s483_s30 = scalar_lea.hbm %s690_s3, 512 }
  0x26   :  { %p484_p2 = scmp.ne.s32.totalorder %s690_s3, %s483_s30  ;;  %p487_p3 = scmp.lt.u32.totalorder %s483_s30, %s690_s3 }
  0x28   :  { %p489_p4 = pnand %p487_p3, %p484_p2 }
  0x2a   :  { %492 = shalt.err (!%p489_p4)
}
  0x2b   :  { %s493_s14 = scalar_lea.vmem %s46_s18, 512  ;;  %p498_p6 = scmp.lt.s32.totalorder %s46_s18, %s46_s18 }
  0x2c   :  { %p494_p5 = scmp.ne.s32.totalorder %s46_s18, %s493_s14  ;;  %p499_p7 = scmp.lt.s32.totalorder %s493_s14, %s493_s14 }
  0x2e   :  { %p500_p8 = por %p499_p7, %p498_p6 }
  0x30   :  { %p501_p9 = pnand %p500_p8, %p494_p5 }
  0x32   :  { %504 = shalt.err (!%p501_p9)
}
  0x33   :  { %51 = dma.hbm_to_vmem [thread:$0]  %s690_s3, 512, %s46_s18, [#allocation6], %s558_s11, %s558_s11, %s559_s12  }
  0x34   :  { %s562_s16 = smov [#allocation8]   ;;  %s505_s21 = scalar_lea.hbm %s692_s5, 512 }
  0x35   :  { %s59_s17 = sshll.u32 %s562_s16, 4  ;;  %p506_p10 = scmp.ne.s32.totalorder %s692_s5, %s505_s21  ;;  %s60_s17 = int_to_ptr.vmem [resolvable:$true] %s59_s17 }
  0x36   :  { %p509_p11 = scmp.lt.u32.totalorder %s505_s21, %s692_s5 }
  0x38   :  { %p511_p12 = pnand %p509_p11, %p506_p10 }
  0x3a   :  { %514 = shalt.err (!%p511_p12)
}
  0x3b   :  { %s515_s1 = scalar_lea.vmem %s60_s17, 512  ;;  %p520_p0 = scmp.lt.s32.totalorder %s60_s17, %s60_s17 }
  0x3c   :  { %p516_p13 = scmp.ne.s32.totalorder %s60_s17, %s515_s1  ;;  %p521_p1 = scmp.lt.s32.totalorder %s515_s1, %s515_s1 }
  0x3e   :  { %p522_p2 = por %p521_p1, %p520_p0 }
  0x40   :  { %p523_p3 = pnand %p522_p2, %p516_p13 }
  0x42   :  { %526 = shalt.err (!%p523_p3)
}
  0x43   :  { %65 = dma.hbm_to_vmem [thread:$0]  %s692_s5, 512, %s60_s17, [#allocation9], %s558_s11, %s558_s11, %s559_s12  }
  0x44   :  { %549 = dma.done.wait [#allocation3], 128  }
  0x45   :  { %550 = vsyncadd [#allocation3], 4294967168 }
  0x46   :  { %551 = dma.done.wait [#allocation6], 768  }
  0x47   :  { %552 = vsyncadd [#allocation6], 4294966528 }
  0x48   :  { %553 = dma.done.wait [#allocation9], 512  }
  0x49   :  { %554 = vsyncadd [#allocation9], 4294966784  ;;  %v563_v0 = vmov 0.0|0.0   ;;  %vm564_vm0 = vmmov 0   ;;  %v565_v1 = vmov 0.0   ;;  %v81_v2 = vld [vmem:[#allocation5] sm:$0xff] }
  0x4a   :  { %410 = vmatprep.subr.bf16.mxu0 %v563_v0  ;;  %385 = vmatprep.mubr.msk.f32.mxu0 %vm564_vm0, %v565_v1  ;;  %v82_v3 = vld [vmem:[#allocation5 + $0x8] sm:$0xff]  ;;  %v80_v5 = vld [vmem:[#allocation2] sm:$0xff]  ;;  %vm90_vm1 = vcmask 130048   ;;  %v169_v6 = vld [vmem:[#allocation7] sm:$0xff]  ;;  %vm180_vm2 = vcmask 261120   ;;  %s566_s28 = smov [#allocation10]  }
  0x4b   :  { %413 = vmatprep.subr.bf16.mxu1 %v563_v0  ;;  %396 = vmatprep.mubr.msk.f32.mxu1 %vm564_vm0, %v565_v1  ;;  %v411_v4 = vpack.c.bf16 %v82_v3, %v81_v2  ;;  %v170_v7 = vld [vmem:[#allocation7 + $0x8] sm:$0xff]  ;;  %v171_v9 = vld [vmem:[#allocation7 + $0x10] sm:$0xff]  ;;  %v172_v10 = vld [vmem:[#allocation7 + $0x18] sm:$0xff]  ;;  %s351_s29 = sshll.u32 %s566_s28, 4  ;;  %vm343_vm3 = vcmask 785408   ;;  %s352_s29 = int_to_ptr.vmem [resolvable:$true] %s351_s29 }
  0x4c   :  { %v414_v8 = vpack.c.bf16 %v170_v7, %v169_v6  ;;  %v417_v11 = vpack.c.bf16 %v172_v10, %v171_v9  ;;  %v362_v12 = vld [vmem:[%s689_s2] ss:$0 sm:$0xff]  ;;  %v259_v21 = vld [vmem:[#allocation8] sm:$0xff]  ;;  %v261_v24 = vld [vmem:[#allocation8 + $0x10] sm:$0xff]  ;;  %p532_p5 = scmp.lt.s32.totalorder %s352_s29, %s352_s29 }
  0x4d   :  { %412 = vmatpush3.bf16.msra.mxu0 %v411_v4  ;;  %v260_v22 = vld [vmem:[#allocation8 + $0x8] sm:$0xff]  ;;  %v262_v25 = vld [vmem:[#allocation8 + $0x18] sm:$0xff] }
  0x4e   :  { %419 = vmatprep.subr.bf16.mxu0 %v563_v0  ;;  %415 = vmatpush3.bf16.msra.mxu1 %v414_v8  ;;  %v420_v23 = vpack.c.bf16 %v260_v22, %v259_v21  ;;  %v423_v26 = vpack.c.bf16 %v262_v25, %v261_v24  ;;  %v364_v27 = vld [vmem:[%s691_s4] ss:$0 sm:$0xff]  ;;  %s527_s4 = scalar_lea.vmem %s352_s29, 128 }
  0x4f   :  { %416 = vmatprep.subr.bf16.mxu1 %v563_v0  ;;  %v366_v36 = vld [vmem:[%s693_s6] ss:$0 sm:$0xff]  ;;  %p528_p4 = scmp.ne.s32.totalorder %s352_s29, %s527_s4  ;;  %p533_p6 = scmp.lt.s32.totalorder %s527_s4, %s527_s4 }
  0x50   :  { %386 = vmatmul.mubr.msk.f32.vlgmr.msra.gmra.mrb[0].mxu0 %vm90_vm1, %v80_v5 }
  0x51   :  { %407 = vmatprep.mubr.msk.f32.mxu0 %vm564_vm0, %v565_v1  ;;  %421 = vmatpush3.bf16.msra.mxu0 %v420_v23  ;;  %p534_p7 = por %p533_p6, %p532_p5 }
  0x52   :  { %418 = vmatpush3.bf16.msra.mxu1 %v417_v11  ;;  %422 = vmatprep.subr.bf16.mxu0 %v563_v0 }
  0x53   :  { %p535_p8 = pnand %p534_p7, %p528_p4 }
  0x55   :  { %424 = vmatpush3.bf16.msra.mxu0 %v423_v26 }
 0x123   :  { %v160_v13 = vpop.f32.mrb[0].mxu0 }
 0x124   :  { %v161_v14 = vadd.f32 %v362_v12, %v160_v13  ;;  %v387_v15 = vpop.f32.mrb[1].mxu0 }
 0x126   :  { %v165_v16 = vmul.f32 0.70710677, %v161_v14  ;;  %v164_v18 = vmul.f32 0.5, %v161_v14 }
 0x128   :  { %435 = verf.f32 %v165_v16 }
 0x132   :  { %v436_v17 = vpop.eup %435 }
 0x133   :  { %v167_v19 = vadd.f32 1.0, %v436_v17 }
 0x135   :  { %v168_v20 = vmul.f32 %v167_v19, %v164_v18 }
 0x137   :  { %397 = vmatmul.mubr.msk.f32.vlgmr.msra.gmra.mrb[0].mxu1 %vm180_vm2, %v168_v20 }
 0x20a   :  { %v250_v28 = vpop.f32.mrb[0].mxu1 }
 0x20b   :  { %v251_v29 = vadd.f32 %v364_v27, %v250_v28  ;;  %v398_v30 = vpop.f32.mrb[1].mxu1 }
 0x20d   :  { %v255_v31 = vmul.f32 0.70710677, %v251_v29  ;;  %v254_v33 = vmul.f32 0.5, %v251_v29 }
 0x20f   :  { %437 = verf.f32 %v255_v31 }
 0x219   :  { %v438_v32 = vpop.eup %437 }
 0x21a   :  { %v257_v34 = vadd.f32 1.0, %v438_v32 }
 0x21c   :  { %v258_v35 = vmul.f32 %v257_v34, %v254_v33 }
 0x21e   :  { %408 = vmatmul.mubr.msk.f32.vlgmr.msra.gmra.mrb[2].mxu0 %vm180_vm2, %v258_v35 }
 0x2f1   :  { %v339_v37 = vpop.f32.mrb[2].mxu0 }
 0x2f2   :  { %v340_v38 = vadd.f32 %v366_v36, %v339_v37  ;;  %v409_v39 = vpop.f32.mrb[3].mxu0 }
 0x2f4   :  { %344 = vst.msk [vmem:[#allocation10] sm:$0xff] %vm343_vm3, %v340_v38 }
 0x2f5   :  { %538 = shalt.err (!%p535_p8)
}
 0x2f6   :  { %s539_s9 = scalar_lea.hbm %s694_s7, 128 }
 0x2f7   :  { %p540_p9 = scmp.ne.s32.totalorder %s694_s7, %s539_s9  ;;  %p543_p10 = scmp.lt.u32.totalorder %s539_s9, %s694_s7 }
 0x2f9   :  { %p545_p11 = pnand %p543_p10, %p540_p9 }
 0x2fb   :  { %548 = shalt.err (!%p545_p11)
}
 0x2fc   :  { %354 = dma.vmem_to_hbm [thread:$0]  %s352_s29, 128, %s694_s7, [#allocation4]  }
 0x2fd   :  { %555 = dma.done.wait [#allocation4], 128  }
 0x2fe   :  { %556 = vsyncadd [#allocation4], 4294967168 }
 0x2ff   :  { %358 = vsyncpa [#allocation3], 1 }
 0x300   :  { %359 = vsyncpa [#allocation6], 1 }
 0x301   :  { %360 = vsyncpa [#allocation9], 1 }
 0x302   :  { %361 = vsyncpa [#allocation4], 1 }

</bundles_post_ra>
